<compile_context>
chip_gen: v7x
topology: tpu7x:2x2x1
jax: 0.10.0
libtpu: 0.0.40
codegen_flags: <defaults>
</compile_context>

<pallas_src>
import functools

import jax
import jax.numpy as jnp
from jax import lax
from jax.experimental import pallas as pl
from jax.experimental.pallas import tpu as pltpu

_SUBLANE = 8
_LANE = 128


def _round_up(x, m):
    return ((x + m - 1) // m) * m


def _tpu_budgets():
    """Returns (per-tile f32-footprint budget, vmem_limit_bytes, multi_core_hint)."""
    vmem = 128 * 1024 * 1024
    try:
        info = pltpu.get_tpu_info()
        vmem = int(getattr(info, "vmem_capacity_bytes", vmem))
    except Exception:
        pass
    if vmem <= 64 * 1024 * 1024:
        # v7x-class: 64 MiB VMEM/core, 2 TensorCores/chip -> smaller tiles, headroom
        # for the in-kernel f32 upcast chain and Mosaic scratch.
        return 4 * 1024 * 1024, 48 * 1024 * 1024, True
    # v5e / v6e: 128 MiB VMEM, single TensorCore, HBM-bound -> big tiles.
    return 8 * 1024 * 1024, 100 * 1024 * 1024, False


def _choose_block_rows(n, c, tile_budget, multi_core):
    n_pad8 = _round_up(n, _SUBLANE)
    # Budget on the f32 footprint: kernel math is f32 regardless of input dtype,
    # and this keeps (2x input buffers + f32 temporaries) inside the VMEM limit.
    tn = tile_budget // max(1, c * 4)
    # Cap so the (TN, 1) int32 target block (lane-padded to 512 B/row in VMEM, plus
    # a per-row strided DMA) stays a small fraction of the logits tile.
    # TODO(synk): lane-dense targets + in-kernel relayout to lift this for tiny C.
    tn = min(tn, 4096)
    tn = max(_SUBLANE, (tn // _SUBLANE) * _SUBLANE)
    tn = min(tn, n_pad8)
    if multi_core and n_pad8 >= 2 * _SUBLANE:
        # v7x: keep grid_n >= 2 so the "parallel" grid axis uses both TensorCores.
        tn = min(tn, max(_SUBLANE, (n_pad8 // 2) // _SUBLANE * _SUBLANE))
    return int(tn)


def _focal_factor(one_minus_p, gamma):
    if gamma == 0.0:
        # torch: (1 - p) ** 0 == 1 even when p == 1; avoid the 0**0 NaN path.
        return jnp.ones_like(one_minus_p)
    g = float(gamma)
    if g.is_integer() and 0.0 < g <= 16.0:
        # Unrolled VPU multiplies; keeps the EUP slot free for the softmax exp.
        acc = one_minus_p
        for _ in range(int(g) - 1):
            acc = acc * one_minus_p
        return acc
    # Non-integer gamma: exp(g * log(x)) on the EUP; x <= 0 maps to 0 (x**g == 0 for
    # g > 0), matching torch up to the degenerate p > 1 rounding case.
    safe = jnp.maximum(one_minus_p, 1e-30)
    powed = jnp.exp(g * jnp.log(safe))
    return jnp.where(one_minus_p > 0.0, powed, 0.0)


def _focal_loss_kernel(*refs, gamma, n_rem, has_weight):
    # refs: logits (TN, C) native dtype, target (TN, 1) i32, [weight (1, C) f32],
    #       out (1, 8, 128) f32 partial sum.
    if has_weight:
        logits_ref, target_ref, weight_ref, out_ref = refs
    else:
        logits_ref, target_ref, out_ref = refs
        weight_ref = None
    tn, c = logits_ref.shape

    x = logits_ref[...].astype(jnp.float32)          # f32 math on native-dtype tiles
    t = target_ref[...]                              # (TN, 1) int32

    # Numerically stable log-softmax along the class (lane) axis.
    m = jnp.max(x, axis=-1, keepdims=True)           # (TN, 1)
    z = x - m
    lse = jnp.log(jnp.sum(jnp.exp(z), axis=-1, keepdims=True))

    # Single masked gather (exactly one hot lane per row) -> 3 cross-lane reductions.
    col = lax.broadcasted_iota(jnp.int32, (tn, c), 1)
    onehot = col == t
    if has_weight:
        w = weight_ref[...]                           # (1, C) f32, VMEM-resident
        ce = -jnp.sum(jnp.where(onehot, (z - lse) * w, 0.0), axis=-1, keepdims=True)
    else:
        # Fast path: only the target lane needs log-softmax; gather z_t, add lse.
        z_t = jnp.sum(jnp.where(onehot, z, 0.0), axis=-1, keepdims=True)
        ce = lse - z_t

    p = jnp.exp(-ce)
    fl = _focal_factor(1.0 - p, gamma) * ce           # (TN, 1)

    def _write(vals):
        # Lane-dense per-tile partial sum; wrapper reduces over tiles and divides by N.
        out_ref[...] = jnp.sum(vals) * jnp.ones(out_ref.shape, jnp.float32)

    if n_rem == 0:
        _write(fl)
    else:
        last = pl.num_programs(0) - 1

        @pl.when(pl.program_id(0) == last)
        def _():
            row = lax.broadcasted_iota(jnp.int32, (tn, 1), 0)
            _write(jnp.where(row < n_rem, fl, 0.0))

        @pl.when(pl.program_id(0) != last)
        def _():
            _write(fl)


def focal_loss_pallas(logits, target, weight=None, gamma=0.0, block_rows=None):
    """logits: [N, C] float (any dtype), target: [N] int, weight: optional [C] float."""
    n, c = logits.shape
    tile_budget, vmem_limit, multi_core = _tpu_budgets()
    if block_rows is None:
        block_rows = _choose_block_rows(n, c, tile_budget, multi_core)
    block_rows = max(_SUBLANE, (int(block_rows) // _SUBLANE) * _SUBLANE)

    grid_n = pl.cdiv(n, block_rows)
    # Rebalance tiles so the zero padding below is (usually) a handful of rows
    # instead of most of a tile.
    block_rows = min(block_rows, _round_up(pl.cdiv(n, grid_n), _SUBLANE))
    grid_n = pl.cdiv(n, block_rows)
    n_pad = grid_n * block_rows

    if n_pad != n:
        # Padded rows are masked out inside the kernel; divisor stays the true N.
        logits = jnp.pad(logits, ((0, n_pad - n), (0, 0)))
        target = jnp.pad(target, (0, n_pad - n))
    target2d = target.astype(jnp.int32).reshape(n_pad, 1)

    has_weight = weight is not None
    inputs = [logits, target2d]
    in_specs = [
        pl.BlockSpec((block_rows, c), lambda i: (i, 0)),
        pl.BlockSpec((block_rows, 1), lambda i: (i, 0)),
    ]
    if has_weight:
        inputs.append(weight.astype(jnp.float32).reshape(1, c))
        # Constant index map -> class weights stay resident in VMEM across the grid.
        in_specs.append(pl.BlockSpec((1, c), lambda i: (0, 0)))

    kernel = functools.partial(
        _focal_loss_kernel,
        gamma=float(gamma),
        n_rem=int(n % block_rows),
        has_weight=has_weight,
    )

    partials = pl.pallas_call(
        kernel,
        out_shape=jax.ShapeDtypeStruct((grid_n, _SUBLANE, _LANE), jnp.float32),
        grid=(grid_n,),
        in_specs=in_specs,
        out_specs=pl.BlockSpec((1, _SUBLANE, _LANE), lambda i: (i, 0, 0)),
        compiler_params=pltpu.CompilerParams(
            dimension_semantics=("parallel",),
            vmem_limit_bytes=vmem_limit,
        ),
    )(*inputs)

    # Final cross-tile reduction + mean outside the kernel (keeps grid axis parallel).
    return jnp.sum(partials[:, 0, 0]) * (1.0 / n)


def _focal_loss_ref(logits, target, weight, gamma):
    # Pure-JAX reference matching torch F.cross_entropy(reduction='none', weight) +
    # focal_loss(...).mean().
    logp = jax.nn.log_softmax(logits.astype(jnp.float32), axis=-1)
    logp_t = jnp.take_along_axis(logp, target[:, None].astype(jnp.int32), axis=-1)[:, 0]
    w_t = weight[target] if weight is not None else jnp.ones_like(logp_t)
    ce = -w_t * logp_t
    p = jnp.exp(-ce)
    if gamma == 0.0:
        return jnp.mean(ce)
    return jnp.mean((1.0 - p) ** gamma * ce)


if __name__ == "__main__":
    key = jax.random.PRNGKey(0)
    k1, k2, k3 = jax.random.split(key, 3)

    # Case 1: weighted, gamma=2, N not a multiple of the tile -> 3-step pipelined
    # grid, remainder masking via pl.when, weighted gather path.
    N, C = 20, 32
    logits = jax.random.normal(k1, (N, C), dtype=jnp.float32)
    target = jax.random.randint(k2, (N,), 0, C, dtype=jnp.int32)
    weight = 0.5 + jax.random.uniform(k3, (C,), dtype=jnp.float32)

    out = jax.block_until_ready(
        focal_loss_pallas(logits, target, weight=weight, gamma=2.0, block_rows=8))
    ref = _focal_loss_ref(logits, target, weight, 2.0)
    assert jnp.allclose(out, ref, rtol=1e-5, atol=1e-5), (out, ref)

    # Case 2: unweighted fast path, gamma=0, auto tile size (single tile).
    out0 = jax.block_until_ready(
        focal_loss_pallas(logits, target, weight=None, gamma=0.0))
    ref0 = _focal_loss_ref(logits, target, None, 0.0)
    assert jnp.allclose(out0, ref0, rtol=1e-5, atol=1e-5), (out0, ref0)

    # Case 3: bf16 logits (native-dtype DMA, f32 math in-kernel), non-integer gamma.
    N2, C2 = 64, 48
    logits_bf16 = jax.random.normal(k1, (N2, C2), dtype=jnp.float32).astype(jnp.bfloat16)
    target2 = jax.random.randint(k2, (N2,), 0, C2, dtype=jnp.int32)
    weight2 = 0.5 + jax.random.uniform(k3, (C2,), dtype=jnp.float32)
    out2 = jax.block_until_ready(
        focal_loss_pallas(logits_bf16, target2, weight=weight2, gamma=1.5))
    ref2 = _focal_loss_ref(logits_bf16, target2, weight2, 1.5)
    assert jnp.allclose(out2, ref2, rtol=1e-4, atol=1e-4), (out2, ref2)

    print("KERNEL_OK")
</pallas_src>

<mosaic_0001>
module attributes {stable_mosaic.version = 11 : i64} {
  func.func @_focal_loss_kernel(%arg0: i32, %arg1: memref<8x32xf32, #tpu.memory_space<vmem>>, %arg2: memref<8x1xi32, #tpu.memory_space<vmem>>, %arg3: memref<1x32xf32, #tpu.memory_space<vmem>>, %arg4: memref<1x8x128xf32, #tpu.memory_space<vmem>>) attributes {dimension_semantics = [#tpu.dimension_semantics<parallel>], iteration_bounds = array<i64: 3>, scalar_prefetch = 0 : i64, scratch_operands = 0 : i64, tpu.core_type = #tpu.core_type<tc>, window_params = [{transform_indices = @transform_0, window_bounds = array<i64: 8, 32>}, {transform_indices = @transform_1, window_bounds = array<i64: 8, 1>}, {pipeline_mode = #tpu.pipeline_mode<synchronous>, transform_indices = @transform_2, window_bounds = array<i64: 1, 32>}, {transform_indices = @transform_3, window_bounds = array<i64: 1, 8, 128>}]} {
    %c0 = arith.constant 0 : index
    %c0_0 = arith.constant 0 : index
    %0 = vector.load %arg1[%c0, %c0_0] : memref<8x32xf32, #tpu.memory_space<vmem>>, vector<8x32xf32>
    %c0_1 = arith.constant 0 : index
    %c0_2 = arith.constant 0 : index
    %1 = vector.load %arg2[%c0_1, %c0_2] : memref<8x1xi32, #tpu.memory_space<vmem>>, vector<8x1xi32>
    %cst = arith.constant dense<0xFF800000> : vector<8xf32>
    %2 = vector.multi_reduction <maximumf>, %0, %cst [1] : vector<8x32xf32> to vector<8xf32>
    %3 = vector.shape_cast %2 : vector<8xf32> to vector<8x1xf32>
    %4 = vector.broadcast %3 : vector<8x1xf32> to vector<8x32xf32>
    %5 = arith.subf %0, %4 : vector<8x32xf32>
    %6 = math.exp %5 : vector<8x32xf32>
    %cst_3 = arith.constant dense<0.000000e+00> : vector<8xf32>
    %7 = vector.multi_reduction <add>, %6, %cst_3 [1] : vector<8x32xf32> to vector<8xf32>
    %8 = vector.shape_cast %7 : vector<8xf32> to vector<8x1xf32>
    %9 = math.log %8 : vector<8x1xf32>
    %10 = tpu.iota {dimensions = array<i32: 1>} : vector<8x32xi32>
    %11 = vector.broadcast %1 : vector<8x1xi32> to vector<8x32xi32>
    %12 = arith.cmpi eq, %10, %11 : vector<8x32xi32>
    %c0_4 = arith.constant 0 : index
    %c0_5 = arith.constant 0 : index
    %13 = vector.load %arg3[%c0_4, %c0_5] : memref<1x32xf32, #tpu.memory_space<vmem>>, vector<1x32xf32>
    %14 = vector.broadcast %9 : vector<8x1xf32> to vector<8x32xf32>
    %15 = arith.subf %5, %14 : vector<8x32xf32>
    %16 = vector.broadcast %13 : vector<1x32xf32> to vector<8x32xf32>
    %17 = arith.mulf %15, %16 : vector<8x32xf32>
    %cst_6 = arith.constant 0.000000e+00 : f32
    %18 = vector.broadcast %cst_6 : f32 to vector<8x32xf32>
    %19 = arith.select %12, %17, %18 : vector<8x32xi1>, vector<8x32xf32>
    %cst_7 = arith.constant dense<0.000000e+00> : vector<8xf32>
    %20 = vector.multi_reduction <add>, %19, %cst_7 [1] : vector<8x32xf32> to vector<8xf32>
    %21 = vector.shape_cast %20 : vector<8xf32> to vector<8x1xf32>
    %cst_8 = arith.constant 0.000000e+00 : f32
    %22 = vector.broadcast %cst_8 : f32 to vector<8x1xf32>
    %23 = arith.subf %22, %21 : vector<8x1xf32>
    %cst_9 = arith.constant 0.000000e+00 : f32
    %24 = vector.broadcast %cst_9 : f32 to vector<8x1xf32>
    %25 = arith.subf %24, %23 : vector<8x1xf32>
    %26 = math.exp %25 : vector<8x1xf32>
    %cst_10 = arith.constant 1.000000e+00 : f32
    %27 = vector.broadcast %cst_10 : f32 to vector<8x1xf32>
    %28 = arith.subf %27, %26 : vector<8x1xf32>
    %29 = arith.mulf %28, %28 : vector<8x1xf32>
    %30 = arith.mulf %29, %23 : vector<8x1xf32>
    %c2_i32 = arith.constant 2 : i32
    %31 = arith.cmpi eq, %arg0, %c2_i32 : i32
    %32 = arith.extui %31 : i1 to i32
    %c0_i32 = arith.constant 0 : i32
    %33 = arith.cmpi ne, %32, %c0_i32 : i32
    scf.if %33 {
      %37 = tpu.iota {dimensions = array<i32: 0>} : vector<8x1xi32>
      %c4_i32 = arith.constant 4 : i32
      %38 = vector.broadcast %c4_i32 : i32 to vector<8x1xi32>
      %39 = arith.cmpi slt, %37, %38 : vector<8x1xi32>
      %cst_13 = arith.constant 0.000000e+00 : f32
      %40 = vector.broadcast %cst_13 : f32 to vector<8x1xf32>
      %41 = arith.select %39, %30, %40 : vector<8x1xi1>, vector<8x1xf32>
      %42 = vector.shape_cast %41 : vector<8x1xf32> to vector<1x8x1xf32>
      %cst_14 = arith.constant dense<0.000000e+00> : vector<1xf32>
      %43 = vector.multi_reduction <add>, %42, %cst_14 [1, 2] : vector<1x8x1xf32> to vector<1xf32>
      %44 = vector.shape_cast %43 : vector<1xf32> to vector<1x1x1xf32>
      %45 = vector.extract %44[0, 0, 0] : f32 from vector<1x1x1xf32>
      %cst_15 = arith.constant 1.000000e+00 : f32
      %46 = vector.broadcast %cst_15 : f32 to vector<1x8x128xf32>
      %47 = vector.broadcast %45 : f32 to vector<1x8x128xf32>
      %48 = arith.mulf %47, %46 : vector<1x8x128xf32>
      %c0_16 = arith.constant 0 : index
      %c0_17 = arith.constant 0 : index
      %c0_18 = arith.constant 0 : index
      %49 = vector.load %arg4[%c0_16, %c0_17, %c0_18] : memref<1x8x128xf32, #tpu.memory_space<vmem>>, vector<1x8x128xf32>
      tpu.vector_store %arg4[%c0_16, %c0_17, %c0_18], %48 {strides = array<i32>} : memref<1x8x128xf32, #tpu.memory_space<vmem>>, vector<1x8x128xf32>,
    } else {
    }
    %c2_i32_11 = arith.constant 2 : i32
    %34 = arith.cmpi ne, %arg0, %c2_i32_11 : i32
    %35 = arith.extui %34 : i1 to i32
    %c0_i32_12 = arith.constant 0 : i32
    %36 = arith.cmpi ne, %35, %c0_i32_12 : i32
    scf.if %36 {
      %37 = vector.shape_cast %30 : vector<8x1xf32> to vector<1x8x1xf32>
      %cst_13 = arith.constant dense<0.000000e+00> : vector<1xf32>
      %38 = vector.multi_reduction <add>, %37, %cst_13 [1, 2] : vector<1x8x1xf32> to vector<1xf32>
      %39 = vector.shape_cast %38 : vector<1xf32> to vector<1x1x1xf32>
      %40 = vector.extract %39[0, 0, 0] : f32 from vector<1x1x1xf32>
      %cst_14 = arith.constant 1.000000e+00 : f32
      %41 = vector.broadcast %cst_14 : f32 to vector<1x8x128xf32>
      %42 = vector.broadcast %40 : f32 to vector<1x8x128xf32>
      %43 = arith.mulf %42, %41 : vector<1x8x128xf32>
      %c0_15 = arith.constant 0 : index
      %c0_16 = arith.constant 0 : index
      %c0_17 = arith.constant 0 : index
      %44 = vector.load %arg4[%c0_15, %c0_16, %c0_17] : memref<1x8x128xf32, #tpu.memory_space<vmem>>, vector<1x8x128xf32>
      tpu.vector_store %arg4[%c0_15, %c0_16, %c0_17], %43 {strides = array<i32>} : memref<1x8x128xf32, #tpu.memory_space<vmem>>, vector<1x8x128xf32>,
    } else {
    }
    return
  }
  func.func @transform_0(%arg0: i32) -> (i32, i32) {
    %c0_i32 = arith.constant 0 : i32
    %c0_i32_0 = arith.constant 0 : i32
    return %arg0, %c0_i32 : i32, i32
  }
  func.func @transform_1(%arg0: i32) -> (i32, i32) {
    %c0_i32 = arith.constant 0 : i32
    %c0_i32_0 = arith.constant 0 : i32
    return %arg0, %c0_i32 : i32, i32
  }
  func.func @transform_2(%arg0: i32) -> (i32, i32) {
    %c0_i32 = arith.constant 0 : i32
    %c0_i32_0 = arith.constant 0 : i32
    %c0_i32_1 = arith.constant 0 : i32
    return %c0_i32, %c0_i32_0 : i32, i32
  }
  func.func @transform_3(%arg0: i32) -> (i32, i32, i32) {
    %c0_i32 = arith.constant 0 : i32
    %c0_i32_0 = arith.constant 0 : i32
    %c0_i32_1 = arith.constant 0 : i32
    return %arg0, %c0_i32, %c0_i32_0 : i32, i32, i32
  }
}

</mosaic_0001>

<bundles_post_ra>
// kernel: tpu_custom_call.1
= control target key start
LH: loop header
LB: loop body
LE: loop exit
PB: predicated region body
PF: predicated region fallthrough
CT: control target
= control target key end

     0   :  { %8 = vsyncpa [#allocation3], 0  ;;  %s956_s0 = inlined_call_operand.hbm [shape: f32[24,32], index: 0, kind: input, shape index: {}]   ;;  %s957_s1 = inlined_call_operand.hbm [shape: s32[24,1], index: 1, kind: input, shape index: {}]   ;;  %s958_s2 = inlined_call_operand.hbm [shape: f32[1,32], index: 2, kind: input, shape index: {}]   ;;  %s959_s3 = inlined_call_operand.hbm [shape: f32[3,8,128], index: 3, kind: output, shape index: {}]  }
   0x1   :  { %10 = vsyncpa [#allocation3 + $0x1], 0 }
   0x2   :  { %11 = vsyncpa [#allocation6], 0 }
   0x3   :  { %13 = vsyncpa [#allocation6 + $0x1], 0 }
   0x4   :  { %14 = vsyncpa [#allocation4], 0 }
   0x5   :  { %16 = vsyncpa [#allocation4 + $0x1], 0  ;;  %s713_s12 = smov 0   ;;  %s715_s13 = smov 0  }
   0x6   :  { %s717_s14 = smov 0   ;;  %s719_s15 = smov 0  }
   0x7 LB: > { %s734_s16 = sadd.s32 4294967295, %s686_s15   ;;  %s429_s17 = sadd.s32 4294967294, %s686_s15   ;;  %s686_s15 = sphi %s719_s15, %s985_s15   ;;  %s682_s14 = sphi %s717_s14, %s984_s14   ;;  %s678_s13 = sphi %s715_s13, %s983_s13   ;;  %s674_s12 = sphi %s713_s12, %s982_s12  }
   0x8   : > { %p42_p0 = scmp.ne.s32.totalorder %s678_s13, %s674_s12  ;;  %p960_p1 = scmp.eq.s32.totalorder %s734_s16, 0 }
   0x9   : > { %p119_p3 = scmp.eq.s32.totalorder %s429_s17, 2  ;;  %p430_p5 = scmp.ge.s32.totalorder %s686_s15, 1 }
   0xa   : > { %p743_p4 = por %p960_p1, %p42_p0  ;;  %p126_p7 = scmp.lt.s32.totalorder %s686_s15, 4 }
   0xb   : > { %p748_p6 = por %p119_p3, %p42_p0  ;;  %s688_s21 = smov [#allocation7]  }
   0xc   : > { %s964_s18 = scalar_select %p743_p4, 1, 0 }
   0xd   : > { %s965_s19 = scalar_select %p748_p6, 1, 0 }
   0xe   : > { %p753_p8 = pnand %p430_p5, %p126_p7  ;;  %s139_s22 = sshll.u32 %s688_s21, 4  ;;  %s140_s22 = int_to_ptr.vmem [resolvable:$true] %s139_s22 }
   0xf   : > { %s760_s23 = sadd.s32 1, %s686_s15   ;;  %s29_s27 = sadd.s32 1, %s682_s14 }
  0x10   : > { %s966_s20 = scalar_select %p753_p8, 1, 0 }
  0x11   : > { %p463_p9 = pneg %p753_p8  ;;  %s26_s25 = ssub.s32 %s686_s15, %s760_s23 }
  0x12   : > { %p770_p11 = scmp.eq.s32.totalorder %s26_s25, 0  ;;  %s524_s30 = scalar_lea.hbm %s958_s2, 16 }
  0x13   : > { %p764_p10 = pnand %p463_p9, %p960_p1  ;;  %p525_p13 = scmp.ne.s32.totalorder %s958_s2, %s524_s30 }
  0x14   : > { %s968_s26 = scalar_select %p770_p11, 1, 0 }
  0x15   : > { %p526_p0 = pneg %p764_p10  ;;  %p531_p7 = scmp.lt.u32.totalorder %s524_s30, %s958_s2 }
  0x17   : > { %p527_p3 = pnand %p526_p0, %p525_p13 }
  0x19   : > { %p528_p5 = pneg %p527_p3 }
  0x1b   : > { %p533_p9 = pnand %p531_p7, %p528_p5 }
  0x1d   : > { %536 = shalt.err (!%p533_p9)
}
  0x1e   : > { %s537_s8 = scalar_lea.vmem %s140_s22, 16  ;;  %s544_s9 = scalar_lea.vmem %s140_s22, 32 }
  0x1f   : > { %p538_p1 = scmp.ne.s32.totalorder %s140_s22, %s537_s8  ;;  %p545_p6 = scmp.lt.s32.totalorder %s140_s22, %s140_s22 }
  0x20   : > { %p546_p4 = scmp.lt.s32.totalorder %s544_s9, %s537_s8 }
  0x21   : > { %p540_p2 = pnand %p538_p1, %p526_p0 }
  0x22   : > { %p547_p8 = por %p546_p4, %p545_p6 }
  0x23   : > { %p541_p12 = pneg %p540_p2 }
  0x25   : > { %p548_p11 = pnand %p547_p8, %p541_p12 }
  0x27   : > { %551 = shalt.err (!%p548_p11)
}
  0x28   : > { %466 = dma.hbm_to_vmem [thread:$0]  (!%p764_p10), %s958_s2, 16, %s140_s22, [#allocation6]  }
  0x29   : > { %p969_p1 = scmp.ne.s32.totalorder %s968_s26, 0  ;;  %p37_p2 = scmp.eq.s32.totalorder %s686_s15, 0 }
  0x2a   : > { %p970_p4 = scmp.ne.s32.totalorder %s682_s14, %s678_s13  ;;  %p971_p6 = scmp.eq.s32.totalorder %s734_s16, 2 }
  0x2b   : > { %s796_s17 = scalar_select %p969_p1, %s682_s14, %s29_s27  }
  0x2c   : > { %p804_p8 = por %p971_p6, %p970_p4  ;;  %p479_p11 = scmp.lt.s32.totalorder %s686_s15, 3 }
  0x2d   : > { %s150_s24 = sand.u32 1, %s682_s14   ;;  %p973_p12 = pmov %p970_p4 }
  0x2e   : > { %s972_s21 = scalar_select %p804_p8, 1, 0 }
  0x2f   : > { %p38_p13 = por %p37_p2, %p973_p12  ;;  %s813_s25 = sshll.u32 %s150_s24, 3 }
  0x30   : > { %s434_s28 = sshll.u32 %s686_s15, 7  ;;  %s154_s27 = scalar_lea.vmem [#allocation2], %s813_s25 }
  0x31   : > { %s819_s26 = scalar_lea.hbm %s956_s0, %s434_s28  ;;  %s161_s30 = sshll.u32 %s154_s27, 4  ;;  %s826_s30 = int_to_ptr.vmem [resolvable:$true] %s161_s30 }
  0x32   : > { %p822_p10 = pnand %p479_p11, %p38_p13  ;;  %s831_s7 = scalar_lea.hbm %s957_s1, %s434_s28 }
  0x33   : > { %s151_s8 = scalar_lea.sflag [#allocation3], %s150_s24  ;;  %s552_s9 = scalar_lea.hbm %s819_s26, 128 }
  0x34   : > { %p553_p0 = scmp.ne.s32.totalorder %s819_s26, %s552_s9  ;;  %p554_p3 = pneg %p822_p10 }
  0x35   : > { %s557_s29 = scalar_lea.hbm %s956_s0, 384  ;;  %p558_p9 = scmp.lt.u32.totalorder %s819_s26, %s956_s0 }
  0x36   : > { %p555_p5 = pnand %p554_p3, %p553_p0  ;;  %p559_p1 = scmp.lt.u32.totalorder %s557_s29, %s552_s9 }
  0x37   : > { %p561_p4 = scmp.lt.u32.totalorder %s552_s9, %s819_s26 }
  0x38   : > { %p556_p7 = pneg %p555_p5  ;;  %p560_p2 = por %p559_p1, %p558_p9 }
  0x3a   : > { %p562_p6 = por %p561_p4, %p560_p2 }
  0x3c   : > { %p563_p11 = pnand %p562_p6, %p556_p7 }
  0x3e   : > { %566 = shalt.err (!%p563_p11)
}
  0x3f   : > { %s567_s24 = scalar_lea.vmem %s826_s30, 128  ;;  %s689_s28 = smov [#allocation2]  }
  0x40   : > { %p568_p12 = scmp.ne.s32.totalorder %s826_s30, %s567_s24  ;;  %s572_s5 = sshll.u32 %s689_s28, 4  ;;  %s573_s5 = int_to_ptr.vmem [resolvable:$false] %s572_s5 }
  0x41   : > { %s574_s6 = scalar_lea.vmem %s573_s5, 256  ;;  %p575_p5 = scmp.lt.s32.totalorder %s826_s30, %s573_s5 }
  0x42   : > { %p570_p13 = pnand %p568_p12, %p554_p3  ;;  %p576_p9 = scmp.lt.s32.totalorder %s574_s6, %s567_s24 }
  0x44   : > { %p571_p0 = pneg %p570_p13  ;;  %p577_p1 = por %p576_p9, %p575_p5 }
  0x46   : > { %p578_p2 = pnand %p577_p1, %p571_p0 }
  0x48   : > { %581 = shalt.err (!%p578_p2)
}
  0x49   : > { %470 = dma.hbm_to_vmem [thread:$0]  (!%p822_p10), %s819_s26, 128, %s826_s30, %s151_s8  }
  0x4a   : > { %s168_s9 = sand.u32 1, %s686_s15   ;;  %s172_s10 = scalar_lea.vmem [#allocation5], %s813_s25 }
  0x4b   : > { %s179_s11 = sshll.u32 %s172_s10, 4  ;;  %s169_s29 = scalar_lea.sflag [#allocation6], %s168_s9  ;;  %s180_s11 = int_to_ptr.vmem [resolvable:$true] %s179_s11 }
  0x4c   : > { %s582_s22 = scalar_lea.hbm %s831_s7, 128  ;;  %s587_s28 = scalar_lea.hbm %s957_s1, 384 }
  0x4d   : > { %p583_p7 = scmp.ne.s32.totalorder %s831_s7, %s582_s22  ;;  %p588_p11 = scmp.lt.u32.totalorder %s831_s7, %s957_s1 }
  0x4e   : > { %p589_p12 = scmp.lt.u32.totalorder %s587_s28, %s582_s22  ;;  %p591_p0 = scmp.lt.u32.totalorder %s582_s22, %s831_s7 }
  0x4f   : > { %p585_p4 = pnand %p583_p7, %p554_p3 }
  0x50   : > { %p590_p13 = por %p589_p12, %p588_p11 }
  0x51   : > { %p586_p6 = pneg %p585_p4 }
  0x52   : > { %p592_p5 = por %p591_p0, %p590_p13 }
  0x54   : > { %p593_p9 = pnand %p592_p5, %p586_p6 }
  0x56   : > { %596 = shalt.err (!%p593_p9)
}
  0x57   : > { %s597_s25 = scalar_lea.vmem %s180_s11, 128  ;;  %s690_s26 = smov [#allocation5]  }
  0x58   : > { %p598_p1 = scmp.ne.s32.totalorder %s180_s11, %s597_s25  ;;  %s602_s30 = sshll.u32 %s690_s26, 4  ;;  %s603_s30 = int_to_ptr.vmem [resolvable:$false] %s602_s30 }
  0x59   : > { %s604_s8 = scalar_lea.vmem %s603_s30, 256  ;;  %p605_p4 = scmp.lt.s32.totalorder %s180_s11, %s603_s30 }
  0x5a   : > { %p600_p2 = pnand %p598_p1, %p554_p3  ;;  %p606_p8 = scmp.lt.s32.totalorder %s604_s8, %s597_s25 }
  0x5c   : > { %p601_p7 = pneg %p600_p2  ;;  %p607_p11 = por %p606_p8, %p605_p4 }
  0x5e   : > { %p608_p12 = pnand %p607_p11, %p601_p7 }
  0x60   : > { %611 = shalt.err (!%p608_p12)
}
  0x61   : > { %473 = dma.hbm_to_vmem [thread:$0]  (!%p822_p10), %s831_s7, 128, %s180_s11, %s169_s29  }
  0x62   : > { %p975_p6 = scmp.ne.s32.totalorder %s966_s20, 0 }
  0x63   : > { %s882_s9 = sand.u32 (!%p975_p6), 1, %s678_s13   ;;  %p976_p8 = scmp.ne.s32.totalorder (!%p975_p6), %s964_s18, 0 }
  0x64   : > { %188 = sbr.rel (%p975_p6) target bundleno = 1042 (0x412), region = 32  ;;  %s885_s10 = sshll.u32 (!%p975_p6), %s882_s9, 3 }
  0x65   : > { %s191_s22 = scalar_lea.sflag (!%p975_p6), [#allocation3], %s882_s9  ;;  %s194_s27 = scalar_lea.vmem (!%p975_p6), [#allocation2], %s885_s10 }
  0x6b   : > { %657 = dma.done.wait (%p976_p8), %s191_s22, 128  }
  0x6c   : > { %659 = vsyncadd (%p976_p8), %s191_s22, 4294967168  ;;  %s199_s20 = sand.u32 1, %s734_s16   ;;  %s203_s7 = scalar_lea.vmem [#allocation5], %s885_s10 }
  0x6d   : > { %s200_s4 = scalar_lea.sflag [#allocation6], %s199_s20 }
  0x6e   : > { %661 = dma.done.wait (%p976_p8), %s200_s4, 128  }
  0x6f   : > { %663 = vsyncadd (%p976_p8), %s200_s4, 4294967168  ;;  %p977_p10 = scmp.eq.s32.totalorder %s734_s16, 0 }
  0x71   : > { %665 = dma.done.wait (%p977_p10), [#allocation6], 16   ;;  %p978_p3 = pmov %p977_p10 }
  0x72   : > { %vm237_vm0 = vcmask 261120   ;;  %v235_v0 = vld [vmem:[%s194_s27] sm:$0xff]  ;;  %v236_v2 = vld [vmem:[%s203_s7] sm:$0xff]  ;;  %v691_v3 = vmov 0   ;;  %v249_v10 = vlaneseq  ;;  %s907_s18 = scalar_lea.vmem [#allocation8], %s885_s10  ;;  %p443_p13 = scmp.ne.s32.totalorder %s734_s16, 2 }
  0x73   : > { %667 = vsyncadd (%p978_p3), [#allocation6], 4294967280  ;;  %v238_v1 = vsel %vm237_vm0, %v235_v0, -inf  ;;  %516 = vset.pattern.permute.xlu1 %v691_v3  ;;  %517 = vset.pattern.permute.xlu0 %v691_v3  ;;  %v442_v15 = vld [vmem:[#allocation7] ss:$0 sm:$0xff]  ;;  %vm283_vm2 = vcmask (!%p443_p13), 7168  }
  0x74   : > { %239 = vmax.xlane.f32.xlu0 %v238_v1  ;;  %252 = vperm.xlu1 %516, %v236_v2   ;;  %v250_v12 = vand.u32 127, %v249_v10  ;;  %v280_v28 = vshrl.u32 (!%p443_p13), %v249_v10, 7 }
  0x76   : > { %vm281_vm3 = vcmp.lt.s32.totalorder (!%p443_p13), %v280_v28, 4 }
  0xf3   : > { %v253_v14 = vpop.permute.xlu1 %252 }
  0xf4   : > { %vm254_vm1 = vcmp.eq.s32.totalorder %v250_v12, %v253_v14 }
 0x101   : > { %v240_v4 = vpop.xlane.xlu0 %239 }
 0x102   : > { %v241_v5 = vsub.f32 %v235_v0, %v240_v4 }
 0x104   : > { %v242_v6 = vmul.f32 1.442695, %v241_v5 }
 0x106   : > { %518 = vpow2.f32 %v242_v6 }
 0x110   : > { %v519_v7 = vpop.eup %518 }
 0x111   : > { %v244_v8 = vsel %vm237_vm0, %v519_v7, 0.0 }
 0x112   : > { %245 = vadd.xlane.f32.xlu0 %v244_v8 }
 0x19f   : > { %v246_v9 = vpop.xlane.xlu0 %245 }
 0x1a0   : > { %520 = vlog2.f32 %v246_v9 }
 0x1aa   : > { %v521_v11 = vpop.eup %520 }
 0x1ab   : > { %v248_v13 = vmul.f32 0.6931472, %v521_v11 }
 0x1ad   : > { %v256_v16 = vsub.f32 %v241_v5, %v248_v13 }
 0x1af   : > { %v263_v17 = vmul.f32 %v442_v15, %v256_v16 }
 0x1b1   : > { %v264_v18 = vsel %vm254_vm1, %v263_v17, 0.0 }
 0x1b2   : > { %v265_v19 = vsel %vm237_vm0, %v264_v18, 0.0 }
 0x1b3   : > { %266 = vadd.xlane.f32.xlu1 %v265_v19 }
 0x240   : > { %v267_v20 = vpop.xlane.xlu1 %266 }
 0x241   : > { %v268_v21 = vsub.f32 0.0, %v267_v20 }
 0x243   : > { %v269_v22 = vsub.f32 0.0, %v268_v21 }
 0x245   : > { %v270_v23 = vmul.f32 1.442695, %v269_v22 }
 0x247   : > { %522 = vpow2.f32 %v270_v23 }
 0x250   : > { %278 = sbr.rel (%p443_p13) target bundleno = 808 (0x328), region = 48 }
 0x251   : > { %v523_v24 = vpop.eup %522 }
 0x252   : > { %v272_v25 = vsub.f32 1.0, %v523_v24 }
 0x254   : > { %v273_v26 = vmul.f32 %v272_v25, %v272_v25 }
 0x256   : > { %v274_v27 = vmul.f32 %v273_v26, %v268_v21 }
 0x258   : > { %v282_v29 = vsel %vm281_vm3, %v274_v27, 0.0 }
 0x259   : > { %v284_v30 = vsel %vm283_vm2, %v282_v29, 0.0 }
 0x25a   : > { %285 = vadd.xlane.f32.xlu0 %v284_v30 }
 0x2e7   : > { %v286_v31 = vpop.xlane.xlu0 %285 }
 0x2e8   : > { %v287_v32 = vrot.slane %v286_v31, 4 }
 0x2ea   : > { %v288_v33 = vadd.f32 %v287_v32, %v286_v31 }
 0x2ec   : > { %v289_v34 = vrot.slane %v288_v33, 2 }
 0x2ee   : > { %v290_v35 = vadd.f32 %v289_v34, %v288_v33 }
 0x2f0   : > { %v291_v36 = vrot.slane %v290_v35, 1 }
 0x2f2   : > { %v292_v37 = vadd.f32 %v291_v36, %v290_v35 }
 0x2f4   : > { %449 = vpush %v292_v37 }
 0x325   : > { %s450_s11 = spop %449 }
 0x326   : > { %v294_v38 = vstv %s450_s11 }
 0x327   : > { %295 = vst [vmem:[%s907_s18] sm:$0xff] %v294_v38 }
 0x328 PF: > { %p979_p0 = scmp.eq.s32.totalorder %s734_s16, 2 }
 0x329   : > { %vm300_vm4 = vcmask (!%p979_p0), 7168  }
 0x32a   : > { %299 = sbr.rel (%p979_p0) target bundleno = 1017 (0x3f9), region = 52  ;;  %v301_v39 = vsel (!%p979_p0), %vm300_vm4, %v274_v27, 0.0 }
 0x32b   : > { %302 = vadd.xlane.f32.xlu0 (!%p979_p0), %v301_v39 }
 0x3b8   : > { %v303_v40 = vpop.xlane.xlu0 %302 }
 0x3b9   : > { %v304_v41 = vrot.slane %v303_v40, 4 }
 0x3bb   : > { %v305_v42 = vadd.f32 %v304_v41, %v303_v40 }
 0x3bd   : > { %v306_v43 = vrot.slane %v305_v42, 2 }
 0x3bf   : > { %v307_v44 = vadd.f32 %v306_v43, %v305_v42 }
 0x3c1   : > { %v308_v45 = vrot.slane %v307_v44, 1 }
 0x3c3   : > { %v309_v46 = vadd.f32 %v308_v45, %v307_v44 }
 0x3c5   : > { %451 = vpush %v309_v46 }
 0x3f6   : > { %s452_s29 = spop %451 }
 0x3f7   : > { %v311_v47 = vstv %s452_s29 }
 0x3f8   : > { %312 = vst [vmem:[%s907_s18] sm:$0xff] %v311_v47 }
 0x3f9 PF: > { %s446_s24 = sshll.u32 %s734_s16, 7  ;;  %s327_s25 = sshll.u32 %s907_s18, 4  ;;  %s328_s25 = int_to_ptr.vmem [resolvable:$true] %s327_s25 }
 0x3fa   : > { %s918_s6 = scalar_lea.hbm %s959_s3, %s446_s24  ;;  %s314_s26 = scalar_lea.sflag [#allocation4], %s882_s9 }
 0x3fb   : > { %s612_s30 = scalar_lea.vmem %s328_s25, 128  ;;  %p980_p9 = scmp.ne.s32.totalorder %s972_s21, 0 }
 0x3fc   : > { %p613_p5 = scmp.ne.s32.totalorder %s328_s25, %s612_s30  ;;  %s692_s8 = smov [#allocation8]  }
 0x3fd   : > { %s616_s10 = sshll.u32 %s692_s8, 4  ;;  %s617_s10 = int_to_ptr.vmem [resolvable:$false] %s616_s10 }
 0x3fe   : > { %p614_p1 = pnand %p613_p5, %p980_p9  ;;  %s618_s22 = scalar_lea.vmem %s617_s10, 256 }
 0x3ff   : > { %p619_p7 = scmp.lt.s32.totalorder %s328_s25, %s617_s10  ;;  %p620_p4 = scmp.lt.s32.totalorder %s618_s22, %s612_s30 }
 0x400   : > { %p615_p2 = pneg %p614_p1 }
 0x401   : > { %p621_p11 = por %p620_p4, %p619_p7 }
 0x403   : > { %p622_p12 = pnand %p621_p11, %p615_p2 }
 0x405   : > { %625 = shalt.err (!%p622_p12)
}
 0x406   : > { %s626_s16 = scalar_lea.hbm %s918_s6, 128  ;;  %s630_s20 = scalar_lea.hbm %s959_s3, 384 }
 0x407   : > { %p627_p6 = scmp.ne.s32.totalorder %s918_s6, %s626_s16  ;;  %p631_p3 = scmp.lt.u32.totalorder %s918_s6, %s959_s3 }
 0x408   : > { %p632_p13 = scmp.lt.u32.totalorder %s630_s20, %s626_s16  ;;  %p634_p5 = scmp.lt.u32.totalorder %s626_s16, %s918_s6 }
 0x409   : > { %p628_p8 = pnand %p627_p6, %p980_p9 }
 0x40a   : > { %p633_p0 = por %p632_p13, %p631_p3 }
 0x40b   : > { %p629_p10 = pneg %p628_p8 }
 0x40c   : > { %p635_p1 = por %p634_p5, %p633_p0 }
 0x40e   : > { %p636_p2 = pnand %p635_p1, %p629_p10 }
 0x410   : > { %639 = shalt.err (!%p636_p2)
}
 0x411   : > { %461 = dma.vmem_to_hbm [thread:$0]  (%p980_p9), %s328_s25, 128, %s918_s6, %s314_s26  }
 0x412 PF: > { %p481_p7 = scmp.ge.s32.totalorder %s686_s15, 2  ;;  %s339_s18 = sand.u32 1, %s674_s12  }
 0x413   : > { %p981_p4 = scmp.ne.s32.totalorder %s965_s19, 0  ;;  %s340_s11 = scalar_lea.sflag [#allocation4], %s339_s18 }
 0x415   : > { %p475_p11 = pnand %p481_p7, %p981_p4 }
 0x417   : > { %669 = dma.done.wait (!%p475_p11), %s340_s11, 128  }
 0x418   : > { %671 = vsyncadd (!%p475_p11), %s340_s11, 4294967168  ;;  %p19_p12 = scmp.ge.s32.totalorder %s760_s23, 5   ;;  %s982_s12 = smov %s678_s13 }
 0x419   : > { %s983_s13 = smov %s682_s14  ;;  %s984_s14 = smov %s796_s17 }
 0x41a   : > { %s985_s15 = smov %s760_s23  ;;  %21 = sbr.rel (!%p19_p12) target bundleno = 7 (0x7), region = 102 }
 0x421   :  { %345 = vsyncpa [#allocation3], 1 }
 0x422   :  { %347 = vsyncpa [#allocation3 + $0x1], 1 }
 0x423   :  { %348 = vsyncpa [#allocation6], 1 }
 0x424   :  { %350 = vsyncpa [#allocation6 + $0x1], 1 }
 0x425   :  { %351 = vsyncpa [#allocation4], 1 }
 0x426   :  { %353 = vsyncpa [#allocation4 + $0x1], 1 }

</bundles_post_ra>
